<compile_context>
chip_gen: v7x
topology: tpu7x:2x2x1
jax: 0.10.0
libtpu: 0.0.40
codegen_flags: <defaults>
</compile_context>

<pallas_src>
import jax
import jax.numpy as jnp
from jax import lax
from jax.experimental import pallas as pl
from jax.experimental.pallas import tpu as pltpu


def model_kernel(idx_ref, emb_ref, w_ref, b_ref, out_ref):
    bt, S = idx_ref.shape          # batch tile, sentence length
    V, D = emb_ref.shape           # vocab, vector_dim

    # Project the embedding table through the classifier first (bf16 MXU matmul,
    # f32 accumulation); fold the 1/S average-pool scale into the result.
    v_score = jnp.dot(emb_ref[...], w_ref[...],
                      preferred_element_type=jnp.float32) * (1.0 / S)   # (V, 1) f32

    # Per-row token histogram: hist[b, v] = number of times token v appears in
    # row b.  Built with S unrolled 2-D VPU compares (S is small and static) —
    # avg pooling then rides the hist @ v_score matmul for free.
    idx = idx_ref[...]                                                  # (bt, S) int32
    iota_v = lax.broadcasted_iota(jnp.int32, (bt, V), 1)                # (bt, V)
    hist = jnp.zeros((bt, V), jnp.float32)
    for s in range(S):
        hist = hist + (idx[:, s:s + 1] == iota_v).astype(jnp.float32)   # f32 compares (v5e-safe)

    # Linear(D -> 1) + bias (scalar from SMEM) + sigmoid.
    logits = jnp.dot(hist, v_score, preferred_element_type=jnp.float32) + b_ref[0, 0]
    out_ref[...] = jax.nn.sigmoid(logits)                               # (bt, 1)


def torch_model_forward(x, emb_table, w, b, *, batch_tile=None):
    """x: (B, S) int32 token ids. Returns (B, 1) float32 sigmoid predictions.

    emb_table: (V, D), w: (D, 1), b: (1, 1) — all float32 (cast to bf16 for the
    MXU inside).
    """
    B, S = x.shape
    V, D = emb_table.shape

    if batch_tile is None:
        batch_tile = B if B <= 128 else 128
    assert B % batch_tile == 0, "batch must divide evenly into batch tiles"
    grid = (B // batch_tile,)

    emb_bf16 = emb_table.astype(jnp.bfloat16)
    w_bf16 = w.astype(jnp.bfloat16)
    b_smem = b.reshape(1, 1).astype(jnp.float32)

    # NOTE: output is (B, 1); if B grows into the hundreds, a lane-dense (1, B)
    # slab + wrapper reshape would avoid masked partial stores.
    return pl.pallas_call(
        model_kernel,
        out_shape=jax.ShapeDtypeStruct((B, 1), jnp.float32),
        grid=grid,
        in_specs=[
            pl.BlockSpec((batch_tile, S), lambda i: (i, 0),
                         memory_space=pltpu.MemorySpace.VMEM),   # token ids (batch-tiled)
            pl.BlockSpec((V, D), lambda i: (0, 0),
                         memory_space=pltpu.MemorySpace.VMEM),   # embedding table (bf16)
            pl.BlockSpec((D, 1), lambda i: (0, 0),
                         memory_space=pltpu.MemorySpace.VMEM),   # classifier weight (bf16)
            pl.BlockSpec(memory_space=pltpu.MemorySpace.SMEM),   # bias scalar
        ],
        out_specs=pl.BlockSpec((batch_tile, 1), lambda i: (i, 0),
                               memory_space=pltpu.MemorySpace.VMEM),
        compiler_params=pltpu.CompilerParams(
            dimension_semantics=("parallel",)),
    )(x, emb_bf16, w_bf16, b_smem)


if __name__ == "__main__":
    # Small shapes consistent with the module: batch=4, sentence_length=8,
    # vocab=30, vector_dim=32.
    B, S, V, D = 4, 8, 30, 32

    key = jax.random.PRNGKey(0)
    k_idx, k_emb, k_w, k_b = jax.random.split(key, 4)

    # Deterministic synthetic parameters (PyTorch-like inits, not a checkpoint).
    x = jax.random.randint(k_idx, (B, S), minval=0, maxval=V, dtype=jnp.int32)
    emb_table = jax.random.normal(k_emb, (V, D), dtype=jnp.float32)            # nn.Embedding ~ N(0,1)
    bound = 1.0 / jnp.sqrt(D)
    w = jax.random.uniform(k_w, (D, 1), minval=-bound, maxval=bound,
                           dtype=jnp.float32)                                  # nn.Linear weight^T
    b = jax.random.uniform(k_b, (1, 1), minval=-bound, maxval=bound,
                           dtype=jnp.float32)                                  # nn.Linear bias

    y_pred = torch_model_forward(x, emb_table, w, b)
    y_pred = jax.block_until_ready(y_pred)

    # Pure-JAX reference of the same forward semantics, using the same
    # bf16-rounded parameters the kernel feeds to the MXU.
    emb_r = emb_table.astype(jnp.bfloat16).astype(jnp.float32)
    w_r = w.astype(jnp.bfloat16).astype(jnp.float32)
    ref = jax.nn.sigmoid(jnp.mean(emb_r[x], axis=1) @ w_r + b[0])

    assert y_pred.shape == (B, 1)
    assert jnp.allclose(y_pred, ref, atol=1e-4, rtol=1e-4)

    print("KERNEL_OK")
</pallas_src>

<mosaic_0001>
module attributes {stable_mosaic.version = 11 : i64} {
  func.func @model_kernel(%arg0: i32, %arg1: memref<4x8xi32, #tpu.memory_space<vmem>>, %arg2: memref<30x32xbf16, #tpu.memory_space<vmem>>, %arg3: memref<32x1xbf16, #tpu.memory_space<vmem>>, %arg4: memref<1x1xf32, #tpu.memory_space<smem>>, %arg5: memref<4x1xf32, #tpu.memory_space<vmem>>) attributes {dimension_semantics = [#tpu.dimension_semantics<parallel>], iteration_bounds = array<i64: 1>, scalar_prefetch = 0 : i64, scratch_operands = 0 : i64, tpu.core_type = #tpu.core_type<tc>, window_params = [{transform_indices = @transform_0, window_bounds = array<i64: 4, 8>}, {pipeline_mode = #tpu.pipeline_mode<synchronous>, transform_indices = @transform_1, window_bounds = array<i64: 30, 32>}, {pipeline_mode = #tpu.pipeline_mode<synchronous>, transform_indices = @transform_2, window_bounds = array<i64: 32, 1>}, {transform_indices = @transform_3, window_bounds = array<i64: 1, 1>}, {transform_indices = @transform_4, window_bounds = array<i64: 4, 1>}]} {
    %c0 = arith.constant 0 : index
    %c0_0 = arith.constant 0 : index
    %0 = vector.load %arg2[%c0, %c0_0] : memref<30x32xbf16, #tpu.memory_space<vmem>>, vector<30x32xbf16>
    %c0_1 = arith.constant 0 : index
    %c0_2 = arith.constant 0 : index
    %1 = vector.load %arg3[%c0_1, %c0_2] : memref<32x1xbf16, #tpu.memory_space<vmem>>, vector<32x1xbf16>
    %cst = arith.constant dense<0.000000e+00> : vector<30x1xf32>
    %2 = tpu.matmul %0, %1, %cst {dimension_numbers = #tpu.dot_dimension_numbers<[1], [0], [0], [1], [0, 0, 1, 1], [], []>} : vector<30x32xbf16>, vector<32x1xbf16>, vector<30x1xf32> -> vector<30x1xf32>
    %cst_3 = arith.constant 1.250000e-01 : f32
    %3 = vector.broadcast %cst_3 : f32 to vector<30x1xf32>
    %4 = arith.mulf %2, %3 : vector<30x1xf32>
    %c0_4 = arith.constant 0 : index
    %c0_5 = arith.constant 0 : index
    %5 = vector.load %arg1[%c0_4, %c0_5] : memref<4x8xi32, #tpu.memory_space<vmem>>, vector<4x8xi32>
    %6 = tpu.iota {dimensions = array<i32: 1>} : vector<4x30xi32>
    %cst_6 = arith.constant 0.000000e+00 : f32
    %7 = vector.broadcast %cst_6 : f32 to vector<4x30xf32>
    %8 = vector.extract_strided_slice %5 {offsets = [0, 0], sizes = [4, 1], strides = [1, 1]} : vector<4x8xi32> to vector<4x1xi32>
    %9 = vector.broadcast %8 : vector<4x1xi32> to vector<4x30xi32>
    %10 = arith.cmpi eq, %9, %6 : vector<4x30xi32>
    %11 = arith.extui %10 : vector<4x30xi1> to vector<4x30xi32>
    %12 = arith.sitofp %11 : vector<4x30xi32> to vector<4x30xf32>
    %13 = arith.addf %7, %12 : vector<4x30xf32>
    %14 = vector.extract_strided_slice %5 {offsets = [0, 1], sizes = [4, 1], strides = [1, 1]} : vector<4x8xi32> to vector<4x1xi32>
    %15 = vector.broadcast %14 : vector<4x1xi32> to vector<4x30xi32>
    %16 = arith.cmpi eq, %15, %6 : vector<4x30xi32>
    %17 = arith.extui %16 : vector<4x30xi1> to vector<4x30xi32>
    %18 = arith.sitofp %17 : vector<4x30xi32> to vector<4x30xf32>
    %19 = arith.addf %13, %18 : vector<4x30xf32>
    %20 = vector.extract_strided_slice %5 {offsets = [0, 2], sizes = [4, 1], strides = [1, 1]} : vector<4x8xi32> to vector<4x1xi32>
    %21 = vector.broadcast %20 : vector<4x1xi32> to vector<4x30xi32>
    %22 = arith.cmpi eq, %21, %6 : vector<4x30xi32>
    %23 = arith.extui %22 : vector<4x30xi1> to vector<4x30xi32>
    %24 = arith.sitofp %23 : vector<4x30xi32> to vector<4x30xf32>
    %25 = arith.addf %19, %24 : vector<4x30xf32>
    %26 = vector.extract_strided_slice %5 {offsets = [0, 3], sizes = [4, 1], strides = [1, 1]} : vector<4x8xi32> to vector<4x1xi32>
    %27 = vector.broadcast %26 : vector<4x1xi32> to vector<4x30xi32>
    %28 = arith.cmpi eq, %27, %6 : vector<4x30xi32>
    %29 = arith.extui %28 : vector<4x30xi1> to vector<4x30xi32>
    %30 = arith.sitofp %29 : vector<4x30xi32> to vector<4x30xf32>
    %31 = arith.addf %25, %30 : vector<4x30xf32>
    %32 = vector.extract_strided_slice %5 {offsets = [0, 4], sizes = [4, 1], strides = [1, 1]} : vector<4x8xi32> to vector<4x1xi32>
    %33 = vector.broadcast %32 : vector<4x1xi32> to vector<4x30xi32>
    %34 = arith.cmpi eq, %33, %6 : vector<4x30xi32>
    %35 = arith.extui %34 : vector<4x30xi1> to vector<4x30xi32>
    %36 = arith.sitofp %35 : vector<4x30xi32> to vector<4x30xf32>
    %37 = arith.addf %31, %36 : vector<4x30xf32>
    %38 = vector.extract_strided_slice %5 {offsets = [0, 5], sizes = [4, 1], strides = [1, 1]} : vector<4x8xi32> to vector<4x1xi32>
    %39 = vector.broadcast %38 : vector<4x1xi32> to vector<4x30xi32>
    %40 = arith.cmpi eq, %39, %6 : vector<4x30xi32>
    %41 = arith.extui %40 : vector<4x30xi1> to vector<4x30xi32>
    %42 = arith.sitofp %41 : vector<4x30xi32> to vector<4x30xf32>
    %43 = arith.addf %37, %42 : vector<4x30xf32>
    %44 = vector.extract_strided_slice %5 {offsets = [0, 6], sizes = [4, 1], strides = [1, 1]} : vector<4x8xi32> to vector<4x1xi32>
    %45 = vector.broadcast %44 : vector<4x1xi32> to vector<4x30xi32>
    %46 = arith.cmpi eq, %45, %6 : vector<4x30xi32>
    %47 = arith.extui %46 : vector<4x30xi1> to vector<4x30xi32>
    %48 = arith.sitofp %47 : vector<4x30xi32> to vector<4x30xf32>
    %49 = arith.addf %43, %48 : vector<4x30xf32>
    %50 = vector.extract_strided_slice %5 {offsets = [0, 7], sizes = [4, 1], strides = [1, 1]} : vector<4x8xi32> to vector<4x1xi32>
    %51 = vector.broadcast %50 : vector<4x1xi32> to vector<4x30xi32>
    %52 = arith.cmpi eq, %51, %6 : vector<4x30xi32>
    %53 = arith.extui %52 : vector<4x30xi1> to vector<4x30xi32>
    %54 = arith.sitofp %53 : vector<4x30xi32> to vector<4x30xf32>
    %55 = arith.addf %49, %54 : vector<4x30xf32>
    %cst_7 = arith.constant dense<0.000000e+00> : vector<4x1xf32>
    %56 = tpu.matmul %55, %4, %cst_7 {dimension_numbers = #tpu.dot_dimension_numbers<[1], [0], [0], [1], [0, 0, 1, 1], [], []>} : vector<4x30xf32>, vector<30x1xf32>, vector<4x1xf32> -> vector<4x1xf32>
    %c0_8 = arith.constant 0 : index
    %c0_9 = arith.constant 0 : index
    %57 = memref.load %arg4[%c0_8, %c0_9] : memref<1x1xf32, #tpu.memory_space<smem>>
    %58 = vector.broadcast %57 : f32 to vector<4x1xf32>
    %59 = arith.addf %56, %58 : vector<4x1xf32>
    %60 = arith.negf %59 : vector<4x1xf32>
    %61 = math.exp %60 : vector<4x1xf32>
    %cst_10 = arith.constant 1.000000e+00 : f32
    %62 = vector.broadcast %cst_10 : f32 to vector<4x1xf32>
    %63 = arith.addf %62, %61 : vector<4x1xf32>
    %64 = arith.divf %62, %63 : vector<4x1xf32>
    %c0_11 = arith.constant 0 : index
    %c0_12 = arith.constant 0 : index
    %65 = vector.load %arg5[%c0_11, %c0_12] : memref<4x1xf32, #tpu.memory_space<vmem>>, vector<4x1xf32>
    tpu.vector_store %arg5[%c0_11, %c0_12], %64 {strides = array<i32>} : memref<4x1xf32, #tpu.memory_space<vmem>>, vector<4x1xf32>,
    return
  }
  func.func @transform_0(%arg0: i32) -> (i32, i32) {
    %c0_i32 = arith.constant 0 : i32
    %c0_i32_0 = arith.constant 0 : i32
    return %arg0, %c0_i32 : i32, i32
  }
  func.func @transform_1(%arg0: i32) -> (i32, i32) {
    %c0_i32 = arith.constant 0 : i32
    %c0_i32_0 = arith.constant 0 : i32
    %c0_i32_1 = arith.constant 0 : i32
    return %c0_i32, %c0_i32_0 : i32, i32
  }
  func.func @transform_2(%arg0: i32) -> (i32, i32) {
    %c0_i32 = arith.constant 0 : i32
    %c0_i32_0 = arith.constant 0 : i32
    %c0_i32_1 = arith.constant 0 : i32
    return %c0_i32, %c0_i32_0 : i32, i32
  }
  func.func @transform_3(%arg0: i32) -> (i32, i32) {
    %c0_i32 = arith.constant 0 : i32
    %c0_i32_0 = arith.constant 0 : i32
    %c0_i32_1 = arith.constant 0 : i32
    return %c0_i32, %c0_i32_0 : i32, i32
  }
  func.func @transform_4(%arg0: i32) -> (i32, i32) {
    %c0_i32 = arith.constant 0 : i32
    %c0_i32_0 = arith.constant 0 : i32
    return %arg0, %c0_i32 : i32, i32
  }
}

</mosaic_0001>

<bundles_post_ra>
// kernel: tpu_custom_call.1
= control target key start
LH: loop header
LB: loop body
LE: loop exit
PB: predicated region body
PF: predicated region fallthrough
CT: control target
= control target key end

     0   :  { %v341_v1 = vmov 2   ;;  %v342_v2 = vmov 0   ;;  %vm49_vm0 = vcmask 261120   ;;  %v343_v7 = vmov 3   ;;  %s401_s2 = inlined_call_operand.vmem [shape: bf16[32,1], index: 2, kind: input, shape index: {}]   ;;  %s402_s1 = inlined_call_operand.vmem [shape: bf16[30,32], index: 1, kind: input, shape index: {}]   ;;  %s403_s0 = inlined_call_operand.vmem [shape: s32[4,8], index: 0, kind: input, shape index: {}]   ;;  %s404_s3 = inlined_call_operand.<no memory space> [shape: f32[1,1], index: 3, kind: input, shape index: {}]   ;;  %s405_s4 = inlined_call_operand.vmem [shape: f32[4,1], index: 4, kind: output, shape index: {}]  }
   0x1   :  { %v333_v0 = vld [vmem:[%s401_s2] sm:$0xff]   ;;  %326 = vset.pattern.permute.xlu1 %v341_v1  ;;  %324 = vset.pattern.permute.xlu0 %v342_v2  ;;  %v334_v3 = vld [vmem:[%s401_s2 + $0x8] sm:$0xff]   ;;  %v344_v8 = vmov 1   ;;  %v345_v9 = vmov 4   ;;  %v346_v10 = vmov 5   ;;  %v347_v11 = vmov 6  }
   0x2   :  { %286 = vmatprep.subr.bf16.mxu0 %v333_v0  ;;  %v335_v4 = vld [vmem:[%s402_s1] sm:$0xff]   ;;  %v336_v6 = vld [vmem:[%s402_s1 + $0x8] sm:$0x7f]   ;;  %v348_v12 = vmov 7   ;;  %v349_v13 = vmov 0.0|0.0   ;;  %vm350_vm1 = vmmov 0   ;;  %v110_v16 = vlaneseq }
   0x3   :  { %287 = vmatpush3.bf16.msra.mxu0 %v333_v0  ;;  %290 = vmatprep.mubr.msk.bf16.mxu0 %vm49_vm0, %v335_v4  ;;  %v109_v5 = vld [vmem:[%s403_s0] sm:$0xf]  ;;  %v351_v14 = vmov 0.0   ;;  %vm174_vm9 = vcmask 1045504   ;;  %vm352_vm11 = vmmov 1   ;;  %vm170_vm13 = vcmask 244736  }
   0x4   :  { %288 = vmatprep.subr.bf16.mxu0 %v334_v3  ;;  %127 = vperm.xlu1 %326, %v109_v5   ;;  %v111_v17 = vand.u32 127, %v110_v16  ;;  %vm310_vm12 = vmpackc.low %vm174_vm9, %vm352_vm11  ;;  %v169_v50 = vstv %s404_s3  ;;  %vm254_vm14 = vcmask 3072  }
   0x5   :  { %113 = vperm.xlu0 %324, %v109_v5   ;;  %305 = vmatprep.subr.bf16.mxu1 %v349_v13 }
   0x6   :  { %302 = vmatprep.mubr.msk.f32.mxu1 %vm350_vm1, %v351_v14 }
   0x7   :  { %289 = vmatpush3.bf16.msra.mxu0 %v334_v3 }
   0x8   :  { %327 = vset.pattern.permute.xlu1 %v343_v7 }
   0x9   :  { %325 = vset.pattern.permute.xlu0 %v344_v8  ;;  %134 = vperm.xlu1 %327, %v109_v5  }
   0xa   :  { %291 = vmatmul.mubr.msk.bf16.vlgmr.msra.gmra.mrb[0].mxu0 %vm49_vm0, %v336_v6  ;;  %120 = vperm.xlu0 %325, %v109_v5  }
   0xd   :  { %328 = vset.pattern.permute.xlu1 %v345_v9 }
   0xe   :  { %141 = vperm.xlu1 %328, %v109_v5   ;;  %329 = vset.pattern.permute.xlu0 %v346_v10 }
   0xf   :  { %148 = vperm.xlu0 %329, %v109_v5  }
  0x12   :  { %330 = vset.pattern.permute.xlu1 %v347_v11 }
  0x13   :  { %155 = vperm.xlu1 %330, %v109_v5   ;;  %332 = vset.pattern.permute.xlu0 %v348_v12 }
  0x17   :  { %331 = vset.pattern.permute.xlu1 %v348_v12 }
  0x18   :  { %162 = vperm.xlu1 %331, %v109_v5  }
  0x83   :  { %v128_v18 = vpop.permute.xlu1 %127 }
  0x84   :  { %v114_v15 = vpop.permute.xlu0 %113  ;;  %vm129_vm4 = vcmp.eq.s32.totalorder %v128_v18, %v111_v17 }
  0x85   :  { %vm115_vm2 = vcmp.eq.s32.totalorder %v114_v15, %v111_v17  ;;  %v268_v24 = vsel %vm129_vm4, 1.0, %v351_v14 }
  0x86   :  { %v266_v20 = vsel %vm115_vm2, 1.0, %v351_v14 }
  0x88   :  { %v135_v21 = vpop.permute.xlu1 %134 }
  0x89   :  { %v121_v19 = vpop.permute.xlu0 %120  ;;  %vm136_vm5 = vcmp.eq.s32.totalorder %v135_v21, %v111_v17 }
  0x8a   :  { %vm122_vm3 = vcmp.eq.s32.totalorder %v121_v19, %v111_v17  ;;  %v269_v27 = vsel %vm136_vm5, 1.0, %v351_v14 }
  0x8b   :  { %v267_v22 = vsel %vm122_vm3, 1.0, %v351_v14 }
  0x8c   :  { %v125_v23 = vadd.f32 %v267_v22, %v266_v20 }
  0x8d   :  { %v142_v25 = vpop.permute.xlu1 %141 }
  0x8e   :  { %v132_v26 = vadd.f32 %v268_v24, %v125_v23  ;;  %vm143_vm6 = vcmp.eq.s32.totalorder %v142_v25, %v111_v17  ;;  %v149_v28 = vpop.permute.xlu0 %148 }
  0x8f   :  { %v270_v30 = vsel %vm143_vm6, 1.0, %v351_v14  ;;  %vm150_vm7 = vcmp.eq.s32.totalorder %v149_v28, %v111_v17 }
  0x90   :  { %v139_v29 = vadd.f32 %v269_v27, %v132_v26  ;;  %v271_v35 = vsel %vm150_vm7, 1.0, %v351_v14 }
  0x92   :  { %v156_v31 = vpop.permute.xlu1 %155  ;;  %v146_v33 = vadd.f32 %v270_v30, %v139_v29 }
  0x93   :  { %vm157_vm8 = vcmp.eq.s32.totalorder %v156_v31, %v111_v17 }
  0x94   :  { %v153_v43 = vadd.f32 %v271_v35, %v146_v33  ;;  %v272_v45 = vsel %vm157_vm8, 1.0, %v351_v14 }
  0x96   :  { %v160_v47 = vadd.f32 %v272_v45, %v153_v43 }
  0x97   :  { %v163_v40 = vpop.permute.xlu1 %162 }
  0x98   :  { %vm164_vm10 = vcmp.eq.s32.totalorder %v163_v40, %v111_v17 }
  0x99   :  { %v273_v48 = vsel %vm164_vm10, 1.0, %v351_v14 }
  0x9a   :  { %v167_v49 = vadd.f32 %v273_v48, %v160_v47 }
  0xdd   :  { %v292_v32 = vpop.f32.mrb[0].mxu0 }
  0xde   :  { %v90_v34 = vpop.f32.mrb[1].mxu0  ;;  %v107_v37 = vmul.f32 0.125, %v292_v32 }
  0xdf   :  { %v293_v36 = vpop.f32.mrb[2].mxu0  ;;  %v105_v41 = vmul.f32 0.125, %v90_v34 }
  0xe0   :  { %v108_v38 = vmul.f32 0.125, %v293_v36  ;;  %v93_v39 = vpop.f32.mrb[3].mxu0 }
  0xe1   :  { %v106_v42 = vmul.f32 0.125, %v93_v39 }
  0xe2   :  { %v309_v44 = vpack.c.bf16 %v108_v38, %v107_v37 }
  0xe3   :  { %v306_v46 = vpack.c.bf16 %v106_v42, %v105_v41 }
  0xe5   :  { %307 = vmatpush3.bf16.msra.mxu1 %v306_v46 }
  0xe6   :  { %308 = vmatprep.subr.bf16.mxu1 %v349_v13 }
  0xe9   :  { %311 = vmatpush3.bf16.msk.msra.mxu1 %vm310_vm12, %v309_v44 }
  0xec   :  { %303 = vmatmul.mubr.msk.f32.vlgmr.msra.gmra.mrb[0].mxu1 %vm170_vm13, %v167_v49 }
 0x1bf   :  { %v244_v51 = vpop.f32.mrb[0].mxu1 }
 0x1c0   :  { %v245_v52 = vadd.f32 %v244_v51, %v169_v50  ;;  %v304_v53 = vpop.f32.mrb[1].mxu1 }
 0x1c2   :  { %v276_v54 = vmul.f32 -1.442695, %v245_v52 }
 0x1c4   :  { %337 = vpow2.f32 %v276_v54 }
 0x1ce   :  { %v338_v55 = vpop.eup %337 }
 0x1cf   :  { %v251_v56 = vadd.f32 1.0, %v338_v55 }
 0x1d1   :  { %339 = vrcp.f32 %v251_v56 }
 0x1db   :  { %v340_v57 = vpop.eup %339 }
 0x1dc   :  { %255 = vst.msk [vmem:[%s405_s4] sm:$0xf] %vm254_vm14, %v340_v57 }

</bundles_post_ra>
